<compile_context>
chip_gen: v7x
topology: tpu7x:2x2x1
jax: 0.10.0
libtpu: 0.0.40
codegen_flags: <defaults>
</compile_context>

<pallas_src>
import functools
import math

import numpy as np
import jax
import jax.numpy as jnp
from jax.experimental import pallas as pl
from jax.experimental.pallas import tpu as pltpu

_EPS = 1.1920928955078125e-07   # torch.finfo(torch.float).eps (Kaldi log floor)
_PREEMPH = 0.97                 # torchaudio kaldi default preemphasis_coefficient


# ----------------------------------------------------------------------------
# Parameter / filter-bank setup (deterministic, no checkpoints)
# ----------------------------------------------------------------------------
def hop_and_frame_for_target(num_samples, sr, target_frames, ratio=2.5, snip_edges=True):
    if snip_edges:
        H_float = num_samples / (target_frames - 1 + ratio)
    else:
        H_float = num_samples / target_frames
    H = max(1, int(round(H_float)))
    L = int(round(ratio * H))
    hop_ms = 1000.0 * H / sr
    frame_ms = 1000.0 * L / sr
    return frame_ms, hop_ms


def _next_power_of_2(x: int) -> int:
    return 1 if x == 0 else 2 ** (x - 1).bit_length()


def _round_up(x: int, m: int) -> int:
    return ((x + m - 1) // m) * m


def _get_mel_banks_np(num_bins, window_length_padded, sample_freq, low_freq, high_freq):
    # Port of torchaudio.compliance.kaldi.get_mel_banks (no VTLN), float64.
    num_fft_bins = window_length_padded // 2
    nyquist = 0.5 * sample_freq
    if high_freq <= 0.0:
        high_freq += nyquist
    fft_bin_width = sample_freq / window_length_padded
    mel_low = 1127.0 * math.log(1.0 + low_freq / 700.0)
    mel_high = 1127.0 * math.log(1.0 + high_freq / 700.0)
    mel_freq_delta = (mel_high - mel_low) / (num_bins + 1)
    b = np.arange(num_bins, dtype=np.float64)[:, None]
    left_mel = mel_low + b * mel_freq_delta
    center_mel = mel_low + (b + 1.0) * mel_freq_delta
    right_mel = mel_low + (b + 2.0) * mel_freq_delta
    freqs = fft_bin_width * np.arange(num_fft_bins, dtype=np.float64)
    mel = (1127.0 * np.log(1.0 + freqs / 700.0))[None, :]
    up_slope = (mel - left_mel) / (center_mel - left_mel)
    down_slope = (right_mel - mel) / (right_mel - center_mel)
    return np.maximum(0.0, np.minimum(up_slope, down_slope))   # (num_bins, K)


def _pick_time_tile(total_rows: int) -> int:
    """total_rows is a multiple of 8.  Prefer fat tiles (<= 512 rows) but keep the
    grid >= 2 steps whenever possible so both v7x TensorCores get work."""
    if total_rows <= 8:
        return total_rows
    tm = min(512, max(8, ((total_rows // 2) // 8) * 8))
    while total_rows % tm:
        tm -= 8
    return tm


# ----------------------------------------------------------------------------
# Pallas kernel: one fused DFT matmul + square + mel matmul + log
# ----------------------------------------------------------------------------
def _melspec_kernel(frames_ref, basis_ref, mel_ref, out_ref, *, k, use_log):
    x = frames_ref[...]                                                  # (TM, WF)
    # DC removal + pre-emphasis + Hann window + rDFT folded into one basis.
    y = jnp.dot(x, basis_ref[...], preferred_element_type=jnp.float32)  # (TM, 2K)
    re = y[:, :k]
    im = y[:, k:]
    power = re * re + im * im                                            # |rfft|^2, f32
    mel = jnp.dot(power.astype(mel_ref.dtype), mel_ref[...],
                  preferred_element_type=jnp.float32)                    # (TM, NM_PAD)
    if use_log:
        mel = jnp.log(jnp.maximum(mel, jnp.float32(_EPS)))
    out_ref[...] = mel


def _melspec_pallas(frames, basis, mel_fb, use_log, tm, k_bins):
    T, WF = frames.shape
    _, NM = mel_fb.shape
    assert T % tm == 0
    kernel = functools.partial(_melspec_kernel, k=k_bins, use_log=use_log)
    return pl.pallas_call(
        kernel,
        out_shape=jax.ShapeDtypeStruct((T, NM), jnp.float32),
        grid=(T // tm,),
        in_specs=[
            pl.BlockSpec((tm, WF), lambda i: (i, 0)),             # frame tile
            pl.BlockSpec(basis.shape, lambda i: (0, 0)),          # fused [cos|sin] basis
            pl.BlockSpec(mel_fb.shape, lambda i: (0, 0)),         # mel filter bank (lane-padded)
        ],
        out_specs=pl.BlockSpec((tm, NM), lambda i: (i, 0)),
        compiler_params=pltpu.CompilerParams(dimension_semantics=("parallel",)),
    )(frames, basis, mel_fb)


# ----------------------------------------------------------------------------
# Module wrapper (mirrors the PyTorch MelSpecTransform)
# ----------------------------------------------------------------------------
class MelSpecTransform:
    def __init__(self, sr, n_mels, clip_length, target_time_bins=256, ratio=2.5,
                 frame_length=None, hop_length=None, f_min=20, f_max=None,
                 log=True, snip_edges=True, compute_dtype=jnp.bfloat16):
        self.sr = int(sr)
        self.n_mels = int(n_mels)
        self.target_time_bins = int(target_time_bins)
        self.clip_length = float(clip_length)
        self.ratio = float(ratio)
        self.snip_edges = snip_edges
        self.log = log
        self.f_min = int(f_min)
        self.f_max = int(sr // 2 if f_max is None else f_max)
        # bf16 operands (f32 accumulation) run at native MXU rate; trade-off of
        # ~1e-2 abs error in the log-mel domain vs jnp.float32 bit-closeness.
        self.compute_dtype = compute_dtype
        if hop_length is None or frame_length is None:
            num_samples = int(round(self.clip_length * self.sr))
            frame_ms, hop_ms = hop_and_frame_for_target(
                num_samples, self.sr, self.target_time_bins,
                ratio=self.ratio, snip_edges=self.snip_edges)
            self.hop_length = hop_ms if hop_length is None else hop_length
            self.frame_length = frame_ms if frame_length is None else frame_length
        else:
            self.hop_length = float(hop_length)
            self.frame_length = float(frame_length)

        # TODO(synk): only the Kaldi snip_edges=True framing rule is implemented.
        assert self.snip_edges, "snip_edges=False (reflect-padded framing) not implemented"

        # Kaldi window properties (torchaudio.compliance.kaldi)
        self.window_shift = int(self.sr * self.hop_length * 0.001)
        self.window_size = int(self.sr * self.frame_length * 0.001)
        self.padded_window_size = _next_power_of_2(self.window_size)

        W = self.window_size
        H = self.window_shift
        Np = self.padded_window_size
        K = Np // 2                                  # Nyquist bin dropped (zero mel weight)
        # mel lane pad: 128 when it fits; 256-aligned for n_mels > 128 (fills v6e/v7x MXU N)
        NM_PAD = 128 if self.n_mels <= 128 else _round_up(self.n_mels, 256)

        # Strip-based framing (no gather, any W/H): frame width is ceil(W/H)*H;
        # the extra columns beyond W are multiplied by zero basis rows (exact).
        self.n_strips = -(-W // H)
        self.frame_width = self.n_strips * H

        # --- fold the whole linear preprocessing chain into one DFT basis (float64) ---
        win = 0.5 - 0.5 * np.cos(2.0 * np.pi * np.arange(W, dtype=np.float64) / (W - 1))
        dc = np.eye(W) - np.full((W, W), 1.0 / W)            # per-frame mean removal
        shift = np.zeros((W, W)); shift[0, 0] = 1.0          # replicate-first shift
        shift[np.arange(1, W), np.arange(0, W - 1)] = 1.0
        pre = np.eye(W) - _PREEMPH * shift                   # pre-emphasis
        A = win[:, None] * (pre @ dc)                        # diag(win) @ pre @ dc, (W, W)

        nn = np.arange(W, dtype=np.float64)[:, None]
        kk = np.arange(K, dtype=np.float64)[None, :]
        ang = 2.0 * np.pi * nn * kk / float(Np)              # zero-padding to Np folded away
        basis = np.zeros((self.frame_width, 2 * K), dtype=np.float64)
        basis[:W, :K] = A.T @ np.cos(ang)                    # fused [cos | sin] basis
        basis[:W, K:] = A.T @ np.sin(ang)
        self.dft_basis = jnp.asarray(basis, dtype=self.compute_dtype)   # (WF, 2K)

        mel = _get_mel_banks_np(self.n_mels, Np, float(self.sr),
                                float(self.f_min), float(self.f_max))   # (n_mels, K)
        mel_fb = np.zeros((K, NM_PAD), dtype=np.float64)
        mel_fb[:, :self.n_mels] = mel.T
        self.mel_fb = jnp.asarray(mel_fb, dtype=self.compute_dtype)     # (K, NM_PAD)
        self.n_mels_padded = NM_PAD
        self.spectrum_bins = K

    # ------------------------------------------------------------------
    def transform_batch(self, waves):
        """waves: (B, samples) or (B, channels, samples) -> (B, target_time_bins, n_mels)."""
        waves = jnp.asarray(waves, jnp.float32)
        if waves.ndim == 3:
            waves = waves[:, 0, :]                 # kaldi fbank: channel 0
        B, n = waves.shape
        W, H = self.window_size, self.window_shift
        # NOTE: the global `waveform - waveform.mean()` of the reference is dropped:
        # the folded per-frame DC removal annihilates any constant offset exactly.
        if n < W:                                  # Kaldi snip_edges: 0 frames -> all pad
            return jnp.zeros((B, self.target_time_bins, self.n_mels), jnp.float32)
        m = 1 + (n - W) // H                       # snip_edges frame count
        m_pad = _round_up(m, 8)
        need = (m_pad + self.n_strips - 1) * H     # pad the raw waveform once; framing
        if need > n:                               # then directly yields m_pad rows
            waves = jnp.pad(waves, ((0, 0), (0, need - n)))

        # Strip framing: pure slice + reshape + concat (no XLA gather for any W/H).
        strips = [waves[:, k * H:(k + m_pad) * H].reshape(B, m_pad, H)
                  for k in range(self.n_strips)]
        frames = jnp.concatenate(strips, axis=-1)                      # (B, m_pad, WF)
        frames = frames.reshape(B * m_pad, self.frame_width).astype(self.compute_dtype)

        tm = _pick_time_tile(B * m_pad)
        mel = _melspec_pallas(frames, self.dft_basis, self.mel_fb,
                              self.log, tm, self.spectrum_bins)        # (B*m_pad, NM_PAD)
        mel = mel.reshape(B, m_pad, self.n_mels_padded)[:, :m, :self.n_mels]

        T = mel.shape[1]
        if T < self.target_time_bins:
            mel = jnp.pad(mel, ((0, 0), (0, self.target_time_bins - T), (0, 0)))
        elif T > self.target_time_bins:
            mel = mel[:, :self.target_time_bins]
        return mel

    def __call__(self, waveform):
        """waveform: (channels, samples) or (samples,) -> (1, target_time_bins, n_mels)."""
        waveform = jnp.asarray(waveform, jnp.float32)
        wave = waveform[0] if waveform.ndim == 2 else waveform         # channel 0
        return self.transform_batch(wave[None])                        # (1, T, n_mels)


if __name__ == "__main__":
    # Small, kernel-friendly configuration:
    #   sr=16 kHz, clip of 2176 samples, 16 target time bins, ratio=2 ->
    #   hop = 128 samples (8 ms), frame = 256 samples (16 ms), padded FFT = 256,
    #   K = 128 spectrum bins (Nyquist dropped), fused DFT N = 256, 8 mel bands.
    sr = 16000
    num_samples = 2176
    n_mels = 8
    target_time_bins = 16

    mod = MelSpecTransform(sr=sr, n_mels=n_mels, clip_length=num_samples / sr,
                           target_time_bins=target_time_bins, ratio=2.0)

    key = jax.random.PRNGKey(0)
    k1, k2 = jax.random.split(key)

    # Reference-style single-clip call (stereo -> channel 0), shape (1, T, n_mels).
    waveform = jax.random.normal(k1, (2, num_samples), dtype=jnp.float32)
    spec = jax.block_until_ready(mod(waveform))
    assert spec.shape == (1, target_time_bins, n_mels), spec.shape
    assert spec.dtype == jnp.float32
    assert bool(jnp.all(jnp.isfinite(spec)))

    # Batched path: two clips through ONE pallas_call (amortizes launch/pipeline cost).
    batch = jax.random.normal(k2, (2, num_samples), dtype=jnp.float32)
    spec_b = jax.block_until_ready(mod.transform_batch(batch))
    assert spec_b.shape == (2, target_time_bins, n_mels), spec_b.shape
    assert bool(jnp.all(jnp.isfinite(spec_b)))

    print("KERNEL_OK")
</pallas_src>

<mosaic_0001>
module attributes {stable_mosaic.version = 11 : i64} {
  func.func @_melspec_kernel(%arg0: i32, %arg1: memref<8x256xbf16, #tpu.memory_space<vmem>>, %arg2: memref<256x256xbf16, #tpu.memory_space<vmem>>, %arg3: memref<128x128xbf16, #tpu.memory_space<vmem>>, %arg4: memref<8x128xf32, #tpu.memory_space<vmem>>) attributes {dimension_semantics = [#tpu.dimension_semantics<parallel>], iteration_bounds = array<i64: 2>, scalar_prefetch = 0 : i64, scratch_operands = 0 : i64, tpu.core_type = #tpu.core_type<tc>, window_params = [{transform_indices = @transform_0, window_bounds = array<i64: 8, 256>}, {pipeline_mode = #tpu.pipeline_mode<synchronous>, transform_indices = @transform_1, window_bounds = array<i64: 256, 256>}, {pipeline_mode = #tpu.pipeline_mode<synchronous>, transform_indices = @transform_2, window_bounds = array<i64: 128, 128>}, {transform_indices = @transform_3, window_bounds = array<i64: 8, 128>}]} {
    %c0 = arith.constant 0 : index
    %c0_0 = arith.constant 0 : index
    %0 = vector.load %arg1[%c0, %c0_0] : memref<8x256xbf16, #tpu.memory_space<vmem>>, vector<8x256xbf16>
    %c0_1 = arith.constant 0 : index
    %c0_2 = arith.constant 0 : index
    %1 = vector.load %arg2[%c0_1, %c0_2] : memref<256x256xbf16, #tpu.memory_space<vmem>>, vector<256x256xbf16>
    %cst = arith.constant dense<0.000000e+00> : vector<8x256xf32>
    %2 = tpu.matmul %0, %1, %cst {dimension_numbers = #tpu.dot_dimension_numbers<[1], [0], [0], [1], [0, 0, 1, 1], [], []>} : vector<8x256xbf16>, vector<256x256xbf16>, vector<8x256xf32> -> vector<8x256xf32>
    %3 = vector.extract_strided_slice %2 {offsets = [0, 0], sizes = [8, 128], strides = [1, 1]} : vector<8x256xf32> to vector<8x128xf32>
    %4 = vector.extract_strided_slice %2 {offsets = [0, 128], sizes = [8, 128], strides = [1, 1]} : vector<8x256xf32> to vector<8x128xf32>
    %5 = arith.mulf %3, %3 : vector<8x128xf32>
    %6 = arith.mulf %4, %4 : vector<8x128xf32>
    %7 = arith.addf %5, %6 : vector<8x128xf32>
    %8 = arith.truncf %7 : vector<8x128xf32> to vector<8x128xbf16>
    %c0_3 = arith.constant 0 : index
    %c0_4 = arith.constant 0 : index
    %9 = vector.load %arg3[%c0_3, %c0_4] : memref<128x128xbf16, #tpu.memory_space<vmem>>, vector<128x128xbf16>
    %cst_5 = arith.constant dense<0.000000e+00> : vector<8x128xf32>
    %10 = tpu.matmul %8, %9, %cst_5 {dimension_numbers = #tpu.dot_dimension_numbers<[1], [0], [0], [1], [0, 0, 1, 1], [], []>} : vector<8x128xbf16>, vector<128x128xbf16>, vector<8x128xf32> -> vector<8x128xf32>
    %cst_6 = arith.constant 1.1920929E-7 : f32
    %11 = vector.broadcast %cst_6 : f32 to vector<8x128xf32>
    %12 = arith.maximumf %10, %11 : vector<8x128xf32>
    %13 = math.log %12 : vector<8x128xf32>
    %c0_7 = arith.constant 0 : index
    %c0_8 = arith.constant 0 : index
    %14 = vector.load %arg4[%c0_7, %c0_8] : memref<8x128xf32, #tpu.memory_space<vmem>>, vector<8x128xf32>
    tpu.vector_store %arg4[%c0_7, %c0_8], %13 {strides = array<i32>} : memref<8x128xf32, #tpu.memory_space<vmem>>, vector<8x128xf32>,
    return
  }
  func.func @transform_0(%arg0: i32) -> (i32, i32) {
    %c0_i32 = arith.constant 0 : i32
    %c0_i32_0 = arith.constant 0 : i32
    return %arg0, %c0_i32 : i32, i32
  }
  func.func @transform_1(%arg0: i32) -> (i32, i32) {
    %c0_i32 = arith.constant 0 : i32
    %c0_i32_0 = arith.constant 0 : i32
    %c0_i32_1 = arith.constant 0 : i32
    return %c0_i32, %c0_i32_0 : i32, i32
  }
  func.func @transform_2(%arg0: i32) -> (i32, i32) {
    %c0_i32 = arith.constant 0 : i32
    %c0_i32_0 = arith.constant 0 : i32
    %c0_i32_1 = arith.constant 0 : i32
    return %c0_i32, %c0_i32_0 : i32, i32
  }
  func.func @transform_3(%arg0: i32) -> (i32, i32) {
    %c0_i32 = arith.constant 0 : i32
    %c0_i32_0 = arith.constant 0 : i32
    return %arg0, %c0_i32 : i32, i32
  }
}

</mosaic_0001>

<bundles_post_ra>
// kernel: tpu_custom_call.1
= control target key start
LH: loop header
LB: loop body
LE: loop exit
PB: predicated region body
PF: predicated region fallthrough
CT: control target
= control target key end

     0   :  { %8 = vsyncpa [#allocation3], 0  ;;  %s1328_s0 = inlined_call_operand.hbm [shape: bf16[16,256], index: 0, kind: input, shape index: {}]   ;;  %s1329_s1 = inlined_call_operand.hbm [shape: bf16[256,256], index: 1, kind: input, shape index: {}]   ;;  %s1330_s2 = inlined_call_operand.hbm [shape: bf16[128,128], index: 2, kind: input, shape index: {}]   ;;  %s1331_s3 = inlined_call_operand.hbm [shape: f32[16,128], index: 3, kind: output, shape index: {}]  }
   0x1   :  { %10 = vsyncpa [#allocation3 + $0x1], 0 }
   0x2   :  { %11 = vsyncpa [#allocation6], 0 }
   0x3   :  { %12 = vsyncpa [#allocation4], 0 }
   0x4   :  { %14 = vsyncpa [#allocation4 + $0x1], 0  ;;  %s1083_s12 = smov 0   ;;  %s1085_s13 = smov 0  }
   0x5   :  { %s1087_s14 = smov 0   ;;  %s1089_s15 = smov 0  }
   0x6 LB: > { %s1104_s16 = sadd.s32 4294967295, %s1051_s15   ;;  %s673_s17 = sadd.s32 4294967294, %s1051_s15   ;;  %s1051_s15 = sphi %s1089_s15, %s1351_s15   ;;  %s1047_s14 = sphi %s1087_s14, %s1350_s14   ;;  %s1043_s13 = sphi %s1085_s13, %s1349_s13   ;;  %s1039_s12 = sphi %s1083_s12, %s1348_s12  }
   0x7   : > { %p40_p0 = scmp.ne.s32.totalorder %s1043_s13, %s1039_s12  ;;  %p1332_p1 = scmp.eq.s32.totalorder %s1104_s16, 0 }
   0x8   : > { %p112_p3 = scmp.eq.s32.totalorder %s673_s17, 1  ;;  %p674_p5 = scmp.ge.s32.totalorder %s1051_s15, 1 }
   0x9   : > { %p1113_p4 = por %p1332_p1, %p40_p0  ;;  %p119_p7 = scmp.lt.s32.totalorder %s1051_s15, 3 }
   0xa   : > { %p1118_p6 = por %p112_p3, %p40_p0  ;;  %s1053_s21 = smov [#allocation5]  }
   0xb   : > { %s1335_s18 = scalar_select %p1113_p4, 1, 0 }
   0xc   : > { %s1336_s19 = scalar_select %p1118_p6, 1, 0 }
   0xd   : > { %p1123_p8 = pnand %p674_p5, %p119_p7  ;;  %s131_s22 = sshll.u32 %s1053_s21, 4  ;;  %s1127_s22 = int_to_ptr.vmem [resolvable:$true] %s131_s22 }
   0xe   : > { %s1054_s24 = smov [#allocation7]   ;;  %s895_s28 = scalar_lea.hbm %s1329_s1, 4096 }
   0xf   : > { %p774_p9 = pneg %p1123_p8  ;;  %s144_s25 = sshll.u32 %s1054_s24, 4  ;;  %s1138_s25 = int_to_ptr.vmem [resolvable:$true] %s144_s25 }
  0x10   : > { %p896_p12 = scmp.ne.s32.totalorder %s1329_s1, %s895_s28  ;;  %p902_p5 = scmp.lt.u32.totalorder %s895_s28, %s1329_s1 }
  0x11   : > { %p1134_p11 = pnand %p774_p9, %p1332_p1 }
  0x13   : > { %p897_p13 = pneg %p1134_p11 }
  0x15   : > { %p898_p0 = pnand %p897_p13, %p896_p12 }
  0x17   : > { %p899_p3 = pneg %p898_p0 }
  0x19   : > { %p904_p7 = pnand %p902_p5, %p899_p3 }
  0x1b   : > { %907 = shalt.err (!%p904_p7)
}
  0x1c   : > { %s908_s6 = scalar_lea.vmem %s1127_s22, 4096  ;;  %p916_p2 = scmp.lt.s32.totalorder %s1127_s22, %s1127_s22 }
  0x1d   : > { %p909_p9 = scmp.ne.s32.totalorder %s1127_s22, %s908_s6  ;;  %p917_p12 = scmp.lt.s32.totalorder %s908_s6, %s908_s6 }
  0x1f   : > { %p911_p10 = pnand %p909_p9, %p897_p13  ;;  %p918_p0 = por %p917_p12, %p916_p2 }
  0x21   : > { %p912_p1 = pneg %p911_p10 }
  0x23   : > { %p919_p6 = pnand %p918_p0, %p912_p1 }
  0x25   : > { %922 = shalt.err (!%p919_p6)
}
  0x26   : > { %s1055_s7 = smov 128   ;;  %s1056_s8 = smov 8  }
  0x27   : > { %777 = dma.hbm_to_vmem [thread:$0]  (!%p1134_p11), %s1329_s1, 4096, %s1127_s22, [#allocation6], %s1055_s7, %s1055_s7, %s1056_s8  }
  0x28   : > { %s923_s21 = scalar_lea.hbm %s1330_s2, 1024 }
  0x29   : > { %p924_p2 = scmp.ne.s32.totalorder %s1330_s2, %s923_s21  ;;  %p930_p10 = scmp.lt.u32.totalorder %s923_s21, %s1330_s2 }
  0x2b   : > { %p926_p1 = pnand %p924_p2, %p897_p13 }
  0x2d   : > { %p927_p6 = pneg %p926_p1 }
  0x2f   : > { %p932_p3 = pnand %p930_p10, %p927_p6 }
  0x31   : > { %935 = shalt.err (!%p932_p3)
}
  0x32   : > { %s936_s22 = scalar_lea.vmem %s1138_s25, 1024  ;;  %p944_p12 = scmp.lt.s32.totalorder %s1138_s25, %s1138_s25 }
  0x33   : > { %p937_p5 = scmp.ne.s32.totalorder %s1138_s25, %s936_s22  ;;  %p945_p0 = scmp.lt.s32.totalorder %s936_s22, %s936_s22 }
  0x35   : > { %p939_p7 = pnand %p937_p5, %p897_p13  ;;  %p946_p2 = por %p945_p0, %p944_p12 }
  0x37   : > { %p940_p9 = pneg %p939_p7 }
  0x39   : > { %p947_p1 = pnand %p946_p2, %p940_p9 }
  0x3b   : > { %950 = shalt.err (!%p947_p1)
}
  0x3c   : > { %s1057_s29 = smov 64   ;;  %s1058_s30 = smov 4  }
  0x3d   : > { %780 = dma.hbm_to_vmem [thread:$0]  (!%p1134_p11), %s1330_s2, 1024, %s1138_s25, [#allocation6], %s1057_s29, %s1057_s29, %s1058_s30  }
  0x3e   : > { %s1193_s6 = sadd.s32 1, %s1051_s15   ;;  %s27_s8 = sadd.s32 1, %s1047_s14 }
  0x3f   : > { %s24_s7 = ssub.s32 %s1051_s15, %s1193_s6  ;;  %p34_p6 = scmp.ne.s32.totalorder %s1047_s14, %s1043_s13 }
  0x40   : > { %p25_p13 = scmp.eq.s32.totalorder %s24_s7, 0  ;;  %p35_p10 = scmp.eq.s32.totalorder %s1051_s15, 0 }
  0x41   : > { %p1339_p5 = scmp.eq.s32.totalorder %s1104_s16, 1  ;;  %p791_p9 = scmp.lt.s32.totalorder %s1051_s15, 2 }
  0x42   : > { %s1202_s9 = scalar_select %p25_p13, %s1047_s14, %s27_s8  }
  0x43   : > { %p36_p3 = por %p35_p10, %p34_p6  ;;  %p1206_p7 = por %p1339_p5, %p34_p6 }
  0x44   : > { %s158_s23 = sand.u32 1, %s1047_s14   ;;  %s732_s25 = sshll.u32 %s1051_s15, 7 }
  0x45   : > { %s1340_s10 = scalar_select %p1206_p7, 1, 0 }
  0x46   : > { %s678_s11 = sshll.u32 %s158_s23, 3  ;;  %s1216_s24 = scalar_lea.hbm %s1328_s0, %s732_s25 }
  0x47   : > { %s162_s26 = scalar_lea.vmem [#allocation2], %s678_s11  ;;  %p1220_p11 = pnand %p791_p9, %p36_p3 }
  0x48   : > { %s170_s27 = sshll.u32 %s162_s26, 4  ;;  %s159_s22 = scalar_lea.sflag [#allocation3], %s158_s23  ;;  %s1218_s27 = int_to_ptr.vmem [resolvable:$true] %s170_s27 }
  0x49   : > { %s951_s29 = scalar_lea.hbm %s1216_s24, 128  ;;  %p953_p0 = pneg %p1220_p11 }
  0x4a   : > { %p952_p12 = scmp.ne.s32.totalorder %s1216_s24, %s951_s29  ;;  %s956_s5 = scalar_lea.hbm %s1328_s0, 256 }
  0x4b   : > { %p957_p13 = scmp.lt.u32.totalorder %s1216_s24, %s1328_s0  ;;  %p958_p6 = scmp.lt.u32.totalorder %s956_s5, %s951_s29 }
  0x4c   : > { %p954_p2 = pnand %p953_p0, %p952_p12  ;;  %p960_p3 = scmp.lt.u32.totalorder %s951_s29, %s1216_s24 }
  0x4d   : > { %p959_p10 = por %p958_p6, %p957_p13 }
  0x4e   : > { %p955_p1 = pneg %p954_p2 }
  0x4f   : > { %p961_p5 = por %p960_p3, %p959_p10 }
  0x51   : > { %p962_p9 = pnand %p961_p5, %p955_p1 }
  0x53   : > { %965 = shalt.err (!%p962_p9)
}
  0x54   : > { %s966_s23 = scalar_lea.vmem %s1218_s27, 128  ;;  %s1059_s11 = smov [#allocation2]  }
  0x55   : > { %p967_p12 = scmp.ne.s32.totalorder %s1218_s27, %s966_s23  ;;  %s971_s25 = sshll.u32 %s1059_s11, 4  ;;  %s972_s25 = int_to_ptr.vmem [resolvable:$false] %s971_s25 }
  0x56   : > { %s973_s17 = scalar_lea.vmem %s972_s25, 256  ;;  %p974_p4 = scmp.lt.s32.totalorder %s1218_s27, %s972_s25 }
  0x57   : > { %p969_p2 = pnand %p967_p12, %p953_p0  ;;  %p975_p13 = scmp.lt.s32.totalorder %s973_s17, %s966_s23 }
  0x59   : > { %p970_p7 = pneg %p969_p2  ;;  %p976_p6 = por %p975_p13, %p974_p4 }
  0x5b   : > { %p977_p10 = pnand %p976_p6, %p970_p7 }
  0x5d   : > { %980 = shalt.err (!%p977_p10)
}
  0x5e   : > { %784 = dma.hbm_to_vmem [thread:$0]  (!%p1220_p11), %s1216_s24, 128, %s1218_s27, %s159_s22  }
  0x5f   : > { %179 = sbr.rel (%p1123_p8) target bundleno = 631 (0x277), region = 32  ;;  %s1252_s21 = sand.u32 (!%p1123_p8), 1, %s1043_s13  }
  0x60   : > { %s682_s26 = sshll.u32 (!%p1123_p8), %s1252_s21, 3  ;;  %s182_s29 = scalar_lea.sflag (!%p1123_p8), [#allocation3], %s1252_s21 }
  0x61   : > { %s1258_s30 = scalar_lea.vmem (!%p1123_p8), [#allocation2], %s682_s26  ;;  %p1342_p4 = scmp.ne.s32.totalorder (!%p1123_p8), %s1335_s18, 0 }
  0x66   : > { %1026 = dma.done.wait (%p1342_p4), %s182_s29, 128  }
  0x67   : > { %1028 = vsyncadd (%p1342_p4), %s182_s29, 4294967168  ;;  %p1343_p7 = scmp.eq.s32.totalorder %s1104_s16, 0 }
  0x69   : > { %1030 = dma.done.wait (%p1343_p7), [#allocation6], 5120   ;;  %p1344_p8 = pmov %p1343_p7 }
  0x6a   : > { %v1060_v0 = vmov 0.0   ;;  %v835_v1 = vld [vmem:[#allocation5 + $0x4] ss:$8 sps:$4 sm:$0xff]   ;;  %v837_v2 = vld [vmem:[#allocation5] ss:$8 sps:$4 sm:$0xff]   ;;  %v217_v14 = vld [vmem:[%s1258_s30] sm:$0xff] }
  0x6b   : > { %1032 = vsyncadd (%p1344_p8), [#allocation6], 4294962176  ;;  %742 = vmatprep.subr.bf16.mxu1 %v1060_v0  ;;  %417 = vmatprep.subr.bf16.mxu0 %v835_v1  ;;  %v838_v3 = vld [vmem:[#allocation5 + $0x14] ss:$8 sps:$4 sm:$0xff]   ;;  %v840_v4 = vld [vmem:[#allocation5 + $0x10] ss:$8 sps:$4 sm:$0xff]   ;;  %v687_v15 = vcombine.high %v217_v14, %v217_v14  ;;  %v686_v41 = vcombine.low %v217_v14, %v217_v14 }
  0x6c   : > { %418 = vmatpush1.bf16.msra.mxu0 %v837_v2  ;;  %v841_v5 = vld [vmem:[#allocation5 + $0x24] ss:$8 sps:$4 sm:$0xff]   ;;  %v843_v6 = vld [vmem:[#allocation5 + $0x20] ss:$8 sps:$4 sm:$0xff]   ;;  %v844_v7 = vld [vmem:[#allocation5 + $0x34] ss:$8 sps:$4 sm:$0xff]  }
  0x6d   : > { %419 = vmatprep.subr.bf16.mxu0 %v838_v3  ;;  %v846_v8 = vld [vmem:[#allocation5 + $0x30] ss:$8 sps:$4 sm:$0xff]   ;;  %v847_v9 = vld [vmem:[#allocation5 + $0x44] ss:$8 sps:$4 sm:$0xff]   ;;  %v849_v10 = vld [vmem:[#allocation5 + $0x40] ss:$8 sps:$4 sm:$0xff]   ;;  %449 = vmatprep.mubr.bf16.mxu0 %v687_v15 }
  0x6e   : > { %v850_v11 = vld [vmem:[#allocation5 + $0x54] ss:$8 sps:$4 sm:$0xff]   ;;  %v852_v12 = vld [vmem:[#allocation5 + $0x50] ss:$8 sps:$4 sm:$0xff]   ;;  %v853_v13 = vld [vmem:[#allocation5 + $0x64] ss:$8 sps:$4 sm:$0xff]  }
  0x6f   : > { %v885_v16 = vld [vmem:[#allocation7] sm:$0xff]   ;;  %v856_v18 = vld [vmem:[#allocation5 + $0x74] ss:$8 sps:$4 sm:$0xff]   ;;  %v886_v19 = vld [vmem:[#allocation7 + $0x8] sm:$0xff]   ;;  %vm1061_vm0 = vmmov 0   ;;  %s729_s18 = sshll.u32 %s1104_s16, 7 }
  0x70   : > { %420 = vmatpush1.bf16.msra.mxu0 %v840_v4  ;;  %v855_v17 = vld [vmem:[#allocation5 + $0x60] ss:$8 sps:$4 sm:$0xff]   ;;  %743 = vmatpush3.bf16.msra.mxu1 %v885_v16  ;;  %v858_v20 = vld [vmem:[#allocation5 + $0x70] ss:$8 sps:$4 sm:$0xff]   ;;  %v859_v21 = vld [vmem:[#allocation5 + $0x84] ss:$8 sps:$4 sm:$0xff]   ;;  %s1284_s22 = scalar_lea.hbm %s1331_s3, %s729_s18 }
  0x71   : > { %421 = vmatprep.subr.bf16.mxu0 %v841_v5  ;;  %744 = vmatprep.subr.bf16.mxu1 %v1060_v0  ;;  %v887_v22 = vld [vmem:[#allocation7 + $0x10] sm:$0xff]   ;;  %v861_v23 = vld [vmem:[#allocation5 + $0x80] ss:$8 sps:$4 sm:$0xff]   ;;  %v888_v25 = vld [vmem:[#allocation7 + $0x18] sm:$0xff]   ;;  %s215_s20 = scalar_lea.vmem [#allocation8], %s682_s26  ;;  %s571_s4 = scalar_lea.sflag [#allocation4], %s1252_s21 }
  0x72   : > { %v862_v24 = vld [vmem:[#allocation5 + $0x94] ss:$8 sps:$4 sm:$0xff]   ;;  %v864_v26 = vld [vmem:[#allocation5 + $0x90] ss:$8 sps:$4 sm:$0xff]   ;;  %v865_v27 = vld [vmem:[#allocation5 + $0xa4] ss:$8 sps:$4 sm:$0xff]   ;;  %758 = vmatprep.mubr.msk.bf16.mxu1 %vm1061_vm0, %v1060_v0 }
  0x73   : > { %v889_v28 = vld [vmem:[#allocation7 + $0x20] sm:$0xff]   ;;  %v868_v30 = vld [vmem:[#allocation5 + $0xb4] ss:$8 sps:$4 sm:$0xff]   ;;  %v890_v31 = vld [vmem:[#allocation7 + $0x28] sm:$0xff]   ;;  %s584_s24 = sshll.u32 %s215_s20, 4  ;;  %p1345_p0 = scmp.ne.s32.totalorder %s1340_s10, 0  ;;  %s1286_s24 = int_to_ptr.vmem [resolvable:$true] %s584_s24 }
  0x74   : > { %422 = vmatpush1.bf16.msra.mxu0 %v843_v6  ;;  %745 = vmatpush3.bf16.msra.mxu1 %v886_v19  ;;  %v867_v29 = vld [vmem:[#allocation5 + $0xa0] ss:$8 sps:$4 sm:$0xff]   ;;  %v870_v32 = vld [vmem:[#allocation5 + $0xb0] ss:$8 sps:$4 sm:$0xff]   ;;  %v871_v33 = vld [vmem:[#allocation5 + $0xc4] ss:$8 sps:$4 sm:$0xff]  }
  0x75   : > { %423 = vmatprep.subr.bf16.mxu0 %v844_v7  ;;  %746 = vmatprep.subr.bf16.mxu1 %v1060_v0  ;;  %v873_v34 = vld [vmem:[#allocation5 + $0xc0] ss:$8 sps:$4 sm:$0xff]   ;;  %v874_v35 = vld [vmem:[#allocation5 + $0xd4] ss:$8 sps:$4 sm:$0xff]   ;;  %v876_v36 = vld [vmem:[#allocation5 + $0xd0] ss:$8 sps:$4 sm:$0xff]  }
  0x76   : > { %v877_v37 = vld [vmem:[#allocation5 + $0xe4] ss:$8 sps:$4 sm:$0xff]   ;;  %v879_v38 = vld [vmem:[#allocation5 + $0xe0] ss:$8 sps:$4 sm:$0xff]   ;;  %v880_v39 = vld [vmem:[#allocation5 + $0xf4] ss:$8 sps:$4 sm:$0xff]  }
  0x77   : > { %v882_v40 = vld [vmem:[#allocation5 + $0xf0] ss:$8 sps:$4 sm:$0xff]   ;;  %s981_s5 = scalar_lea.vmem %s1286_s24, 128  ;;  %s1062_s16 = smov [#allocation8]  }
  0x78   : > { %424 = vmatpush1.bf16.msra.mxu0 %v846_v8  ;;  %747 = vmatpush3.bf16.msra.mxu1 %v887_v22  ;;  %v891_v42 = vld [vmem:[#allocation7 + $0x30] sm:$0xff]   ;;  %v892_v43 = vld [vmem:[#allocation7 + $0x38] sm:$0xff]   ;;  %p982_p11 = scmp.ne.s32.totalorder %s1286_s24, %s981_s5  ;;  %s985_s7 = sshll.u32 %s1062_s16, 4  ;;  %s986_s7 = int_to_ptr.vmem [resolvable:$false] %s985_s7 }
  0x79   : > { %425 = vmatprep.subr.bf16.mxu0 %v847_v9  ;;  %748 = vmatprep.subr.bf16.mxu1 %v1060_v0  ;;  %s987_s8 = scalar_lea.vmem %s986_s7, 256  ;;  %p988_p5 = scmp.lt.s32.totalorder %s1286_s24, %s986_s7 }
  0x7a   : > { %p983_p1 = pnand %p982_p11, %p1345_p0  ;;  %p989_p9 = scmp.lt.s32.totalorder %s987_s8, %s981_s5 }
  0x7c   : > { %426 = vmatpush1.bf16.msra.mxu0 %v849_v10  ;;  %749 = vmatpush3.bf16.msra.mxu1 %v888_v25  ;;  %p984_p3 = pneg %p983_p1  ;;  %p990_p12 = por %p989_p9, %p988_p5 }
  0x7d   : > { %427 = vmatprep.subr.bf16.mxu0 %v850_v11  ;;  %750 = vmatprep.subr.bf16.mxu1 %v1060_v0 }
  0x7e   : > { %p991_p2 = pnand %p990_p12, %p984_p3 }
  0x80   : > { %428 = vmatpush1.bf16.msra.mxu0 %v852_v12  ;;  %751 = vmatpush3.bf16.msra.mxu1 %v889_v28 }
  0x81   : > { %429 = vmatprep.subr.bf16.mxu0 %v853_v13  ;;  %752 = vmatprep.subr.bf16.mxu1 %v1060_v0 }
  0x84   : > { %430 = vmatpush1.bf16.msra.mxu0 %v855_v17  ;;  %753 = vmatpush3.bf16.msra.mxu1 %v890_v31 }
  0x85   : > { %431 = vmatprep.subr.bf16.mxu0 %v856_v18  ;;  %754 = vmatprep.subr.bf16.mxu1 %v1060_v0 }
  0x88   : > { %432 = vmatpush1.bf16.msra.mxu0 %v858_v20  ;;  %755 = vmatpush3.bf16.msra.mxu1 %v891_v42 }
  0x89   : > { %433 = vmatprep.subr.bf16.mxu0 %v859_v21  ;;  %756 = vmatprep.subr.bf16.mxu1 %v1060_v0 }
  0x8c   : > { %434 = vmatpush1.bf16.msra.mxu0 %v861_v23  ;;  %757 = vmatpush3.bf16.msra.mxu1 %v892_v43 }
  0x8d   : > { %435 = vmatprep.subr.bf16.mxu0 %v862_v24 }
  0x90   : > { %436 = vmatpush1.bf16.msra.mxu0 %v864_v26 }
  0x91   : > { %437 = vmatprep.subr.bf16.mxu0 %v865_v27 }
  0x94   : > { %438 = vmatpush1.bf16.msra.mxu0 %v867_v29 }
  0x95   : > { %439 = vmatprep.subr.bf16.mxu0 %v868_v30 }
  0x98   : > { %440 = vmatpush1.bf16.msra.mxu0 %v870_v32 }
  0x99   : > { %441 = vmatprep.subr.bf16.mxu0 %v871_v33 }
  0x9c   : > { %442 = vmatpush1.bf16.msra.mxu0 %v873_v34 }
  0x9d   : > { %443 = vmatprep.subr.bf16.mxu0 %v874_v35 }
  0xa0   : > { %444 = vmatpush1.bf16.msra.mxu0 %v876_v36 }
  0xa1   : > { %445 = vmatprep.subr.bf16.mxu0 %v877_v37 }
  0xa4   : > { %446 = vmatpush1.bf16.msra.mxu0 %v879_v38 }
  0xa5   : > { %447 = vmatprep.subr.bf16.mxu0 %v880_v39 }
  0xa8   : > { %448 = vmatpush1.bf16.msra.mxu0 %v882_v40 }
  0xab   : > { %450 = vmatmul.mubr.bf16.vlgmr.msra.gmra.mrb[0].mxu0 %v686_v41 }
 0x17e   : > { %v451_v44 = vpop.f32.mrb[0].mxu0 }
 0x17f   : > { %v458_v45 = vmul.f32 %v451_v44, %v451_v44  ;;  %v453_v46 = vpop.f32.mrb[1].mxu0 }
 0x180   : > { %v459_v47 = vmul.f32 %v453_v46, %v453_v46  ;;  %v455_v48 = vpop.f32.mrb[2].mxu0 }
 0x181   : > { %v456_v49 = vpop.f32.mrb[3].mxu0 }
 0x182   : > { %v460_v50 = vadd.f32 %v459_v47, %v458_v45 }
 0x184   : > { %v461_v51 = vpack.c.bf16 %v460_v50, %v460_v50 }
 0x186   : > { %759 = vmatmul.mubr.bf16.vlgmr.msra.gmra.mrb[0].mxu1 %v461_v51 }
 0x259   : > { %v560_v52 = vpop.f32.mrb[0].mxu1 }
 0x25a   : > { %v566_v53 = vmax.f32 %v560_v52, 1.1920929e-07  ;;  %v760_v54 = vpop.f32.mrb[1].mxu1 }
 0x25b   : > { %v563_v55 = vpop.f32.mrb[2].mxu1 }
 0x25c   : > { %893 = vlog2.f32 %v566_v53  ;;  %v761_v56 = vpop.f32.mrb[3].mxu1 }
 0x266   : > { %v894_v57 = vpop.eup %893 }
 0x267   : > { %v568_v58 = vmul.f32 0.6931472, %v894_v57 }
 0x269   : > { %569 = vst [vmem:[%s215_s20] sm:$0xff] %v568_v58 }
 0x26a   : > { %994 = shalt.err (!%p991_p2)
}
 0x26b   : > { %s995_s23 = scalar_lea.hbm %s1284_s22, 128  ;;  %s999_s17 = scalar_lea.hbm %s1331_s3, 256 }
 0x26c   : > { %p996_p13 = scmp.ne.s32.totalorder %s1284_s22, %s995_s23  ;;  %p1000_p4 = scmp.lt.u32.totalorder %s1284_s22, %s1331_s3 }
 0x26d   : > { %p1001_p7 = scmp.lt.u32.totalorder %s999_s17, %s995_s23  ;;  %p1003_p11 = scmp.lt.u32.totalorder %s995_s23, %s1284_s22 }
 0x26e   : > { %p997_p6 = pnand %p996_p13, %p1345_p0 }
 0x26f   : > { %p1002_p8 = por %p1001_p7, %p1000_p4 }
 0x270   : > { %p998_p10 = pneg %p997_p6 }
 0x271   : > { %p1004_p1 = por %p1003_p11, %p1002_p8 }
 0x273   : > { %p1005_p3 = pnand %p1004_p1, %p998_p10 }
 0x275   : > { %1008 = shalt.err (!%p1005_p3)
}
 0x276   : > { %772 = dma.vmem_to_hbm [thread:$0]  (%p1345_p0), %s1286_s24, 128, %s1284_s22, %s571_s4  }
 0x277 PF: > { %s596_s29 = sand.u32 1, %s1039_s12   ;;  %p1346_p5 = scmp.ne.s32.totalorder %s1336_s19, 0 }
 0x278   : > { %p1347_p9 = scmp.ge.s32.totalorder %s1051_s15, 2  ;;  %s597_s30 = scalar_lea.sflag [#allocation4], %s596_s29 }
 0x27a   : > { %p786_p12 = pnand %p1347_p9, %p1346_p5 }
 0x27c   : > { %1034 = dma.done.wait (!%p786_p12), %s597_s30, 128  }
 0x27d   : > { %1036 = vsyncadd (!%p786_p12), %s597_s30, 4294967168  ;;  %p17_p2 = scmp.ge.s32.totalorder %s1193_s6, 4   ;;  %s1348_s12 = smov %s1043_s13 }
 0x27e   : > { %s1349_s13 = smov %s1047_s14  ;;  %s1350_s14 = smov %s1202_s9 }
 0x27f   : > { %s1351_s15 = smov %s1193_s6  ;;  %19 = sbr.rel (!%p17_p2) target bundleno = 6 (0x6), region = 85 }
 0x286   :  { %602 = vsyncpa [#allocation3], 1 }
 0x287   :  { %604 = vsyncpa [#allocation3 + $0x1], 1 }
 0x288   :  { %605 = vsyncpa [#allocation6], 1 }
 0x289   :  { %606 = vsyncpa [#allocation4], 1 }
 0x28a   :  { %608 = vsyncpa [#allocation4 + $0x1], 1 }

</bundles_post_ra>
